<compile_context>
chip_gen: v5e
topology: v5e:2x2
jax: 0.10.0
libtpu: 0.0.40
codegen_flags: <defaults>
</compile_context>

<pallas_src>
import jax
import jax.numpy as jnp
from jax.experimental import pallas as pl
from jax.experimental.pallas import tpu as pltpu

_SMALL_ELEMS = 64 * 1024                 # below this: plain JAX (launch overhead dominates)
_TARGET_BLOCK_BYTES = 4 * 1024 * 1024    # ~4 MiB/block; x4 (double-buffered in+out) = ~16 MiB
_VMEM_LIMIT_BYTES = 48 * 1024 * 1024     # explicit scoped VMEM (safe on v5e/v6e/v7x)
_ROW_ALIGN = 32                          # sublane packing granularity down to int8/fp8


def _swish_kernel(x_ref, o_ref):
    # Compute in f32 (matches torch SiLU accuracy), cast back to input dtype.
    # Memory-bound: sigmoid's exp runs in the EUP slot, mul/cast on the VPU,
    # all hidden under the HBM DMA.
    xf = x_ref[...].astype(jnp.float32)
    o_ref[...] = (xf * jax.nn.sigmoid(xf)).astype(o_ref.dtype)


def _swish_jax(x: jax.Array) -> jax.Array:
    xf = x.astype(jnp.float32)
    return (xf * jax.nn.sigmoid(xf)).astype(x.dtype)


def _pick_lane(total: int):
    """Widest lane-dense slab width (multiple of 128) that divides `total`."""
    for lane in (512, 256, 128):
        if total % lane == 0:
            return lane
    return None


def _pick_tile_rows(rows: int, lane: int, itemsize: int) -> int:
    # Byte-budgeted rows per block, rounded to a multiple of 32.
    budget = (_TARGET_BLOCK_BYTES // (lane * itemsize)) // _ROW_ALIGN * _ROW_ALIGN
    budget = max(_ROW_ALIGN, budget)
    # Keep >= 4 grid steps: in-core pipelining + megacore sharding headroom.
    cap = max(_ROW_ALIGN, (rows // 4) // _ROW_ALIGN * _ROW_ALIGN)
    tile = min(budget, cap)
    # Best-effort even step count (balanced across v7x's two TensorCores):
    # try a few 32-row decrements, otherwise keep the byte-budgeted tile.
    lo = max(_ROW_ALIGN, tile - 4 * _ROW_ALIGN)
    for t in range(tile, lo - 1, -_ROW_ALIGN):
        if pl.cdiv(rows, t) % 2 == 0:
            return t
    return tile


def swish(x: jax.Array) -> jax.Array:
    """Swish / SiLU activation: x * sigmoid(x). Matches torch semantics."""
    total = x.size
    if total == 0:
        return x

    lane = _pick_lane(total)
    if total <= _SMALL_ELEMS or lane is None:
        # Tiny inputs: pallas_call launch overhead dominates.
        # Non-128-divisible totals: avoid the pad + trailing-slice copies
        # (~2x HBM traffic); XLA's fused elementwise is roofline-ish here.
        return _swish_jax(x)

    itemsize = jnp.dtype(x.dtype).itemsize
    rows = total // lane
    x2 = x.reshape(rows, lane)            # contiguous reshape: no data movement
    tile_rows = _pick_tile_rows(rows, lane, itemsize)
    grid = (pl.cdiv(rows, tile_rows),)    # last block may be ragged -> masked

    out2 = pl.pallas_call(
        _swish_kernel,
        out_shape=jax.ShapeDtypeStruct((rows, lane), x.dtype),
        grid_spec=pltpu.PrefetchScalarGridSpec(
            num_scalar_prefetch=0,
            grid=grid,
            in_specs=[pl.BlockSpec((tile_rows, lane), lambda i: (i, 0))],
            out_specs=pl.BlockSpec((tile_rows, lane), lambda i: (i, 0)),
        ),
        compiler_params=pltpu.CompilerParams(
            dimension_semantics=("parallel",),
            vmem_limit_bytes=_VMEM_LIMIT_BYTES,
        ),
        cost_estimate=pl.CostEstimate(
            flops=5 * total,
            transcendentals=total,
            bytes_accessed=2 * total * itemsize,
        ),
    )(x2)

    return out2.reshape(x.shape)


if __name__ == "__main__":
    key = jax.random.PRNGKey(0)
    k1, k2, k3, k4 = jax.random.split(key, 4)

    # 1) Small NCHW map (typical toy-scale VQGAN block): plain-JAX small path.
    x1 = jax.random.normal(k1, (2, 4, 16, 16), dtype=jnp.float32)
    y1 = jax.block_until_ready(swish(x1))
    assert y1.shape == x1.shape and y1.dtype == x1.dtype
    assert jnp.allclose(y1, x1 * jax.nn.sigmoid(x1), atol=1e-6, rtol=1e-6)

    # 2) Larger f32 map: Pallas lane-dense path, 4 even grid steps.
    x2 = jax.random.normal(k2, (2, 64, 32, 32), dtype=jnp.float32)
    y2 = jax.block_until_ready(swish(x2))
    assert y2.shape == x2.shape and y2.dtype == x2.dtype
    assert jnp.allclose(y2, x2 * jax.nn.sigmoid(x2), atol=1e-6, rtol=1e-6)

    # 3) bf16 map with a ragged last row-block (rows % tile_rows != 0).
    x3 = jax.random.normal(k3, (1, 3, 160, 160), dtype=jnp.bfloat16)
    y3 = jax.block_until_ready(swish(x3))
    x3f = x3.astype(jnp.float32)
    ref3 = (x3f * jax.nn.sigmoid(x3f)).astype(jnp.bfloat16)
    assert y3.shape == x3.shape and y3.dtype == jnp.bfloat16
    assert jnp.allclose(y3.astype(jnp.float32), ref3.astype(jnp.float32),
                        atol=2e-2, rtol=2e-2)

    # 4) Non-128-divisible total: fallback path, no pad/slice copies.
    x4 = jax.random.normal(k4, (2, 8, 65, 65), dtype=jnp.float32)
    y4 = jax.block_until_ready(swish(x4))
    assert y4.shape == x4.shape and y4.dtype == x4.dtype
    assert jnp.allclose(y4, x4 * jax.nn.sigmoid(x4), atol=1e-6, rtol=1e-6)

    print("KERNEL_OK")
</pallas_src>

<mosaic_0001>
module attributes {stable_mosaic.version = 11 : i64} {
  func.func @_swish_kernel(%arg0: i32, %arg1: memref<64x512xf32, #tpu.memory_space<vmem>>, %arg2: memref<64x512xf32, #tpu.memory_space<vmem>>) attributes {dimension_semantics = [#tpu.dimension_semantics<parallel>], iteration_bounds = array<i64: 4>, scalar_prefetch = 0 : i64, scratch_operands = 0 : i64, tpu.core_type = #tpu.core_type<tc>, window_params = [{transform_indices = @transform_0, window_bounds = array<i64: 64, 512>}, {transform_indices = @transform_1, window_bounds = array<i64: 64, 512>}]} {
    %c0 = arith.constant 0 : index
    %c0_0 = arith.constant 0 : index
    %0 = vector.load %arg1[%c0, %c0_0] : memref<64x512xf32, #tpu.memory_space<vmem>>, vector<64x512xf32>
    %1 = arith.negf %0 : vector<64x512xf32>
    %2 = math.exp %1 : vector<64x512xf32>
    %cst = arith.constant 1.000000e+00 : f32
    %3 = vector.broadcast %cst : f32 to vector<64x512xf32>
    %4 = arith.addf %3, %2 : vector<64x512xf32>
    %5 = arith.divf %3, %4 : vector<64x512xf32>
    %6 = arith.mulf %0, %5 : vector<64x512xf32>
    %c0_1 = arith.constant 0 : index
    %c0_2 = arith.constant 0 : index
    %7 = vector.load %arg2[%c0_1, %c0_2] : memref<64x512xf32, #tpu.memory_space<vmem>>, vector<64x512xf32>
    tpu.vector_store %arg2[%c0_1, %c0_2], %6 {strides = array<i32>} : memref<64x512xf32, #tpu.memory_space<vmem>>, vector<64x512xf32>,
    return
  }
  func.func @transform_0(%arg0: i32) -> (i32, i32) {
    %c0_i32 = arith.constant 0 : i32
    %c0_i32_0 = arith.constant 0 : i32
    return %arg0, %c0_i32 : i32, i32
  }
  func.func @transform_1(%arg0: i32) -> (i32, i32) {
    %c0_i32 = arith.constant 0 : i32
    %c0_i32_0 = arith.constant 0 : i32
    return %arg0, %c0_i32 : i32, i32
  }
}

</mosaic_0001>

<bundles_post_ra>
// kernel: tpu_custom_call.1
= control target key start
LH: loop header
LB: loop body
LE: loop exit
PB: predicated region body
PF: predicated region fallthrough
CT: control target
= control target key end

     0   :  { %6 = vsyncpa [#allocation3], 0  ;;  %s2243_s0 = inlined_call_operand.hbm [shape: f32[256,512], index: 0, kind: input, shape index: {}]   ;;  %s2244_s1 = inlined_call_operand.hbm [shape: f32[256,512], index: 1, kind: output, shape index: {}]  }
   0x1   :  { %8 = vsyncpa [#allocation3 + $0x1], 0 }
   0x2   :  { %9 = vsyncpa [#allocation4], 0 }
   0x3   :  { %11 = vsyncpa [#allocation4 + $0x1], 0  ;;  %s1276_s6 = smov 0   ;;  %s1278_s7 = smov 0  }
   0x4   :  { %s1280_s8 = smov 0   ;;  %s1282_s9 = smov 0  }
   0x5 LB: > { %s1297_s10 = sadd.s32 4294967295, %s1260_s9   ;;  %s934_s11 = sadd.s32 4294967294, %s1260_s9   ;;  %s1260_s9 = sphi %s1282_s9, %s2366_s9   ;;  %s1256_s8 = sphi %s1280_s8, %s2365_s8   ;;  %s1252_s7 = sphi %s1278_s7, %s2364_s7   ;;  %s1248_s6 = sphi %s1276_s6, %s2363_s6  }
   0x6   : > { %s1301_s12 = sadd.s32 1, %s1260_s9   ;;  %s24_s13 = sadd.s32 1, %s1256_s8 }
   0x7   : > { %s21_s14 = ssub.s32 %s1260_s9, %s1301_s12  ;;  %p31_p0 = scmp.ne.s32.totalorder %s1256_s8, %s1252_s7 }
   0x8   : > { %p22_p1 = scmp.eq.s32.totalorder %s21_s14, 0  ;;  %p32_p2 = scmp.eq.s32.totalorder %s1260_s9, 0 }
   0x9   : > { %p37_p3 = scmp.ne.s32.totalorder %s1252_s7, %s1248_s6  ;;  %p38_p4 = scmp.eq.s32.totalorder %s1297_s10, 0 }
   0xa   : > { %s1313_s15 = scalar_select %p22_p1, %s1256_s8, %s24_s13  }
   0xb   : > { %p1315_p5 = por %p32_p2, %p31_p0  ;;  %p1319_p6 = por %p38_p4, %p37_p3 }
   0xc   : > { %p61_p7 = scmp.eq.s32.totalorder %s1297_s10, 3  ;;  %p67_p8 = scmp.eq.s32.totalorder %s934_s11, 3 }
   0xd   : > { %p998_p9 = scmp.lt.s32.totalorder %s1260_s9, 4  ;;  %s87_s20 = sand.u32 1, %s1256_s8  }
   0xe   : > { %p1325_p10 = por %p61_p7, %p31_p0  ;;  %p1329_p11 = por %p67_p8, %p37_p3 }
   0xf   : > { %s983_s21 = sshll.u32 %s1260_s9, 8  ;;  %s937_s22 = sshll.u32 %s87_s20, 8 }
  0x10   : > { %s97_s25 = scalar_lea.hbm %s2243_s0, %s983_s21  ;;  %s91_s27 = scalar_lea.vmem [#allocation2], %s937_s22 }
  0x11   : > { %s98_s26 = sshll.u32 %s97_s25, 4  ;;  %s100_s28 = sshll.u32 %s91_s27, 4  ;;  %s99_s26 = int_to_ptr.hbm [resolvable:$true] %s98_s26  ;;  %s101_s28 = int_to_ptr.vmem [resolvable:$true] %s100_s28 }
  0x12   : > { %p1340_p12 = pnand %p998_p9, %p1315_p5  ;;  %p941_p13 = scmp.ge.s32.totalorder %s1260_s9, 1 }
  0x13   : > { %p108_p0 = scmp.lt.s32.totalorder %s1260_s9, 5  ;;  %s88_s30 = scalar_lea.sflag [#allocation3], %s87_s20 }
  0x14   : > { %s1164_s2 = sshra.s32 %s99_s26, 4  ;;  %p1168_p2 = pneg %p1340_p12  ;;  %s1165_s2 = int_to_ptr.hbm [resolvable:$true] %s1164_s2 }
  0x15   : > { %s1166_s3 = scalar_lea.hbm %s1165_s2, 256  ;;  %s1171_s11 = scalar_lea.hbm %s2243_s0, 1024 }
  0x16   : > { %p1167_p1 = scmp.ne.s32.totalorder %s1165_s2, %s1166_s3  ;;  %p1172_p5 = scmp.lt.s32.totalorder %s1165_s2, %s2243_s0 }
  0x17   : > { %p1173_p7 = scmp.lt.s32.totalorder %s1171_s11, %s1166_s3 }
  0x18   : > { %p1169_p3 = pnand %p1168_p2, %p1167_p1 }
  0x19   : > { %p1174_p8 = por %p1173_p7, %p1172_p5 }
  0x1a   : > { %p1170_p4 = pneg %p1169_p3 }
  0x1c   : > { %p1175_p9 = pnand %p1174_p8, %p1170_p4 }
  0x1e   : > { %1178 = shalt.err (!%p1175_p9)
}
  0x1f   : > { %s1262_s16 = smov 512   ;;  %s1263_s20 = smov 32  }
  0x20   : > { %993 = dma.hbm_to_vmem [thread:$0]  (!%p1340_p12), %s99_s26, 4096, %s101_s28, %s88_s30, %s1262_s16, %s1262_s16, %s1263_s20  }
  0x21   : > { %p109_p1 = pnand %p941_p13, %p108_p0 }
  0x22   : > { %s1361_s21 = sand.u32 (!%p109_p1), 1, %s1252_s7  }
  0x23   : > { %112 = sbr.rel (%p109_p1) target bundleno = 195 (0xc3), region = 24  ;;  %s942_s22 = sshll.u32 (!%p109_p1), %s1361_s21, 8 }
  0x24   : > { %s115_s23 = scalar_lea.sflag (!%p109_p1), [#allocation3], %s1361_s21  ;;  %s1367_s24 = scalar_lea.vmem (!%p109_p1), [#allocation2], %s942_s22 }
  0x28   : > { %1239 = dma.done.wait (%p1319_p6), %s115_s23, 4096  }
  0x29   : > { %1241 = vsyncadd (%p1319_p6), %s115_s23, 4294963200  ;;  %v1374_v0 = vld [vmem:[%s1367_s24] sm:$0xff]  ;;  %v1377_v1 = vld [vmem:[%s1367_s24 + $0x8] sm:$0xff]  ;;  %s1529_s17 = scalar_lea.vmem [#allocation5], %s942_s22  ;;  %s985_s25 = sshll.u32 %s1297_s10, 8 }
  0x2a   : > { %v1380_v2 = vld [vmem:[%s1367_s24 + $0x10] sm:$0xff]  ;;  %v944_v3 = vmul.f32 -1.442695, %v1374_v0  ;;  %v945_v4 = vmul.f32 -1.442695, %v1377_v1  ;;  %v1386_v6 = vld [vmem:[%s1367_s24 + $0x18] sm:$0xff]  ;;  %s857_s27 = scalar_lea.hbm %s2244_s1, %s985_s25 }
  0x2b   : > { %v946_v5 = vmul.f32 -1.442695, %v1380_v2  ;;  %v1389_v7 = vld [vmem:[%s1367_s24 + $0x20] sm:$0xff]  ;;  %v1392_v8 = vld [vmem:[%s1367_s24 + $0x28] sm:$0xff]  ;;  %v947_v9 = vmul.f32 -1.442695, %v1386_v6 }
  0x2c   : > { %1036 = vpow2.f32 %v944_v3  ;;  %v948_v10 = vmul.f32 -1.442695, %v1389_v7  ;;  %v949_v11 = vmul.f32 -1.442695, %v1392_v8  ;;  %v1398_v12 = vld [vmem:[%s1367_s24 + $0x30] sm:$0xff]  ;;  %v1401_v13 = vld [vmem:[%s1367_s24 + $0x38] sm:$0xff] }
  0x2d   : > { %1038 = vpow2.f32 %v945_v4  ;;  %v950_v14 = vmul.f32 -1.442695, %v1398_v12  ;;  %v951_v15 = vmul.f32 -1.442695, %v1401_v13  ;;  %v1406_v16 = vld [vmem:[%s1367_s24 + $0x40] sm:$0xff]  ;;  %s858_s28 = sshll.u32 %s1529_s17, 4  ;;  %s859_s28 = int_to_ptr.vmem [resolvable:$true] %s858_s28 }
  0x2e   : > { %1040 = vpow2.f32 %v946_v5  ;;  %v952_v22 = vmul.f32 -1.442695, %v1406_v16  ;;  %v1590_v63 = vld [vmem:[%s1367_s24 + $0x60] sm:$0xff]  ;;  %s860_s29 = sshll.u32 %s857_s27, 4  ;;  %s845_s30 = scalar_lea.sflag [#allocation4], %s1361_s21  ;;  %s861_s29 = int_to_ptr.hbm [resolvable:$true] %s860_s29 }
  0x2f   : > { %1042 = vpow2.f32 %v947_v9  ;;  %s1208_s2 = sshra.s32 %s861_s29, 4  ;;  %s1214_s11 = scalar_lea.hbm %s2244_s1, 1024  ;;  %s1209_s2 = int_to_ptr.hbm [resolvable:$true] %s1208_s2 }
  0x30   : > { %1044 = vpow2.f32 %v948_v10  ;;  %s1210_s3 = scalar_lea.hbm %s1209_s2, 256  ;;  %p1215_p0 = scmp.lt.s32.totalorder %s1209_s2, %s2244_s1 }
  0x31   : > { %1046 = vpow2.f32 %v949_v11  ;;  %p1211_p6 = scmp.ne.s32.totalorder %s1209_s2, %s1210_s3  ;;  %p1216_p2 = scmp.lt.s32.totalorder %s1214_s11, %s1210_s3 }
  0x32   : > { %v1037_v17 = vpop.eup %1036  ;;  %1048 = vpow2.f32 %v950_v14  ;;  %v1603_v14 = vld [vmem:[%s1367_s24 + $0x78] sm:$0xff] }
  0x33   : > { %v1039_v18 = vpop.eup %1038  ;;  %v1408_v19 = vadd.f32 1.0, %v1037_v17  ;;  %1050 = vpow2.f32 %v951_v15  ;;  %p1212_p12 = pnand %p1211_p6, %p1325_p10  ;;  %p1217_p3 = por %p1216_p2, %p1215_p0 }
  0x34   : > { %v1041_v20 = vpop.eup %1040  ;;  %v1410_v21 = vadd.f32 1.0, %v1039_v18 }
  0x35   : > { %v1043_v23 = vpop.eup %1042  ;;  %1052 = vrcp.f32 %v1408_v19  ;;  %v311_v24 = vand.u32 2147483648, %v1408_v19  ;;  %v309_v26 = vand.u32 2147483647, %v1408_v19  ;;  %v1419_v30 = vadd.f32 1.0, %v1041_v20  ;;  %p1213_p13 = pneg %p1212_p12 }
  0x36   : > { %v1045_v25 = vpop.eup %1044  ;;  %1054 = vrcp.f32 %v1410_v21  ;;  %v324_v28 = vand.u32 2147483647, %v1410_v21  ;;  %v326_v29 = vand.u32 2147483648, %v1410_v21  ;;  %v1421_v31 = vadd.f32 1.0, %v1043_v23 }
  0x37   : > { %v1047_v27 = vpop.eup %1046  ;;  %vm305_vm0 = vweird.f32 %v1408_v19  ;;  %v1424_v32 = vadd.f32 1.0, %v1045_v25  ;;  %1056 = vpow2.f32 %v952_v22  ;;  %v1426_v34 = vor.u32 1.1754944e-38, %v311_v24  ;;  %p1218_p4 = pnand %p1217_p3, %p1213_p13 }
  0x38   : > { %v1049_v33 = vpop.eup %1048  ;;  %vm320_vm1 = vweird.f32 %v1410_v21  ;;  %1058 = vrcp.f32 %v1419_v30  ;;  %v341_v35 = vand.u32 2147483648, %v1419_v30  ;;  %vm1431_vm2 = vcmp.eq.f32.partialorder %v309_v26, 8.507059e+37 }
  0x39   : > { %v1051_v36 = vpop.eup %1050  ;;  %v339_v38 = vand.u32 2147483647, %v1419_v30  ;;  %1060 = vrcp.f32 %v1421_v31  ;;  %v356_v39 = vand.u32 2147483648, %v1421_v31  ;;  %v1438_v40 = vadd.f32 1.0, %v1047_v27 }
  0x3a   : > { %vm1440_vm3 = vcmp.eq.f32.partialorder %v324_v28, 8.507059e+37  ;;  %v327_v43 = vor.u32 1.1754944e-38, %v326_v29  ;;  %vm335_vm4 = vweird.f32 %v1419_v30  ;;  %v354_v44 = vand.u32 2147483647, %v1421_v31 }
  0x3b   : > { %v1053_v41 = vpop.eup %1052  ;;  %1062 = vrcp.f32 %v1424_v32  ;;  %v1448_v47 = vor.u32 1.1754944e-38, %v341_v35  ;;  %vm350_vm5 = vweird.f32 %v1421_v31  ;;  %vm365_vm6 = vweird.f32 %v1424_v32 }
  0x3c   : > { %v1055_v45 = vpop.eup %1054  ;;  %v301_v46 = vmul.f32 %v1053_v41, %v1408_v19  ;;  %vm306_vm7 = vweird.f32 %v1053_v41  ;;  %v369_v49 = vand.u32 2147483647, %v1424_v32  ;;  %v371_v50 = vand.u32 2147483648, %v1424_v32 }
  0x3d   : > { %v316_v48 = vmul.f32 %v1055_v45, %v1410_v21  ;;  %v1057_v51 = vpop.eup %1056  ;;  %vm321_vm8 = vweird.f32 %v1055_v45  ;;  %vm1455_vm9 = vcmp.eq.f32.partialorder %v339_v38, 8.507059e+37  ;;  %v1459_v54 = vor.u32 1.1754944e-38, %v356_v39  ;;  %vm1477_vm13 = vmor %vm305_vm0, %vm306_vm7 }
  0x3e   : > { %v302_v52 = vsub.f32 1.0, %v301_v46  ;;  %1064 = vrcp.f32 %v1438_v40  ;;  %v1059_v55 = vpop.eup %1058  ;;  %vm1462_vm10 = vcmp.eq.f32.partialorder %v354_v44, 8.507059e+37  ;;  %v384_v58 = vand.u32 2147483647, %v1438_v40  ;;  %vm1485_vm11 = vmor %vm320_vm1, %vm321_vm8 }
  0x3f   : > { %v317_v56 = vsub.f32 1.0, %v316_v48  ;;  %v386_v59 = vand.u32 2147483648, %v1438_v40  ;;  %v1061_v60 = vpop.eup %1060  ;;  %v331_v62 = vmul.f32 %v1059_v55, %v1419_v30  ;;  %vm1470_vm12 = vcmp.eq.f32.partialorder %v369_v49, 8.507059e+37  ;;  %v1545_v48 = vld [vmem:[%s1367_s24 + $0x48] sm:$0xff]  ;;  %v1548_v49 = vld [vmem:[%s1367_s24 + $0x50] sm:$0xff] }
  0x40   : > { %v303_v61 = vmul.f32 %v1053_v41, %v302_v52  ;;  %v372_v3 = vor.u32 1.1754944e-38, %v371_v50  ;;  %vm336_vm14 = vweird.f32 %v1059_v55  ;;  %v346_v10 = vmul.f32 %v1061_v60, %v1421_v31 }
  0x41   : > { %v1063_v4 = vpop.eup %1062  ;;  %v318_v9 = vmul.f32 %v1055_v45, %v317_v56  ;;  %vm351_vm15 = vweird.f32 %v1061_v60  ;;  %v332_v15 = vsub.f32 1.0, %v331_v62  ;;  %v387_v18 = vor.u32 1.1754944e-38, %v386_v59  ;;  %vm1504_vm1 = vmor %vm335_vm4, %vm336_vm14 }
  0x42   : > { %v304_v11 = vadd.f32 %v1053_v41, %v303_v61  ;;  %v361_v17 = vmul.f32 %v1063_v4, %v1424_v32  ;;  %v347_v20 = vsub.f32 1.0, %v346_v10  ;;  %vm366_vm0 = vweird.f32 %v1063_v4 }
  0x43   : > { %v319_v19 = vadd.f32 %v1055_v45, %v318_v9  ;;  %v1490_v22 = vadd.f32 1.0, %v1049_v33  ;;  %v333_v25 = vmul.f32 %v1059_v55, %v332_v15  ;;  %v1494_v21 = vadd.f32 1.0, %v1051_v36  ;;  %vm1523_vm4 = vmor %vm365_vm6, %vm366_vm0 }
  0x44   : > { %v1065_v23 = vpop.eup %1064  ;;  %v308_v24 = vsel %vm1477_vm13, %v1053_v41, %v304_v11  ;;  %v362_v26 = vsub.f32 1.0, %v361_v17  ;;  %v348_v33 = vmul.f32 %v1061_v60, %v347_v20  ;;  %v1535_v32 = vadd.f32 1.0, %v1057_v51  ;;  %v1600_v11 = vld [vmem:[%s1367_s24 + $0x70] sm:$0xff]  ;;  %v1608_v17 = vld [vmem:[%s1367_s24 + $0x80] sm:$0xff] }
  0x45   : > { %v313_v27 = vsel %vm1431_vm2, %v1426_v34, %v308_v24  ;;  %v323_v28 = vsel %vm1485_vm11, %v1055_v45, %v319_v19  ;;  %v376_v35 = vmul.f32 %v1065_v23, %v1438_v40  ;;  %v334_v38 = vadd.f32 %v1059_v55, %v333_v25  ;;  %vm1515_vm2 = vmor %vm350_vm5, %vm351_vm15 }
  0x46   : > { %v780_v36 = vmul.f32 %v313_v27, %v1374_v0  ;;  %v328_v37 = vsel %vm1440_vm3, %v327_v43, %v323_v28  ;;  %v363_v30 = vmul.f32 %v1063_v4, %v362_v26  ;;  %v349_v41 = vadd.f32 %v1061_v60, %v348_v33 }
  0x47   : > { %v781_v39 = vmul.f32 %v328_v37, %v1377_v1  ;;  %v377_v42 = vsub.f32 1.0, %v376_v35  ;;  %vm381_vm3 = vweird.f32 %v1065_v23  ;;  %v338_v1 = vsel %vm1504_vm1, %v1059_v55, %v334_v38  ;;  %v1565_v55 = vld [vmem:[%s1367_s24 + $0x58] sm:$0xff] }
  0x48   : > { %812 = vst [vmem:[%s1529_s17] sm:$0xff] %v780_v36  ;;  %v364_v31 = vadd.f32 %v1063_v4, %v363_v30  ;;  %1066 = vrcp.f32 %v1490_v22  ;;  %v343_v43 = vsel %vm1455_vm9, %v1448_v47, %v338_v1  ;;  %v353_v44 = vsel %vm1515_vm2, %v1061_v60, %v349_v41 }
  0x49   : > { %813 = vst [vmem:[%s1529_s17 + $0x8] sm:$0xff] %v781_v39  ;;  %v378_v45 = vmul.f32 %v1065_v23, %v377_v42  ;;  %v399_v46 = vand.u32 2147483647, %v1490_v22  ;;  %v782_v50 = vmul.f32 %v343_v43, %v1380_v2  ;;  %v358_v51 = vsel %vm1462_vm10, %v1459_v54, %v353_v44 }
  0x4a   : > { %v368_v47 = vsel %vm1523_vm4, %v1063_v4, %v364_v31  ;;  %vm2270_vm5 = vweird.f32 %v1438_v40  ;;  %v401_v53 = vand.u32 2147483648, %v1490_v22  ;;  %v783_v2 = vmul.f32 %v358_v51, %v1386_v6 }
  0x4b   : > { %vm1559_vm6 = vmor %vm2270_vm5, %vm381_vm3  ;;  %v373_v54 = vsel %vm1470_vm12, %v372_v3, %v368_v47  ;;  %v379_v56 = vadd.f32 %v1065_v23, %v378_v45  ;;  %vm385_vm7 = vcmp.eq.f32.partialorder %v384_v58, 8.507059e+37  ;;  %814 = vst [vmem:[%s1529_s17 + $0x10] sm:$0xff] %v782_v50  ;;  %1068 = vrcp.f32 %v1494_v21  ;;  %v1593_v3 = vld [vmem:[%s1367_s24 + $0x68] sm:$0xff] }
  0x4c   : > { %v784_v57 = vmul.f32 %v373_v54, %v1389_v7  ;;  %v953_v59 = vmul.f32 -1.442695, %v1545_v48  ;;  %v954_v60 = vmul.f32 -1.442695, %v1548_v49  ;;  %815 = vst [vmem:[%s1529_s17 + $0x18] sm:$0xff] %v783_v2  ;;  %vm395_vm8 = vweird.f32 %v1490_v22  ;;  %v1658_v2 = vld [vmem:[%s1367_s24 + $0x90] sm:$0xff] }
  0x4d   : > { %v383_v6 = vsel %vm1559_vm6, %v1065_v23, %v379_v56  ;;  %1070 = vrcp.f32 %v1535_v32  ;;  %v955_v40 = vmul.f32 -1.442695, %v1565_v55  ;;  %vm1584_vm9 = vcmp.eq.f32.partialorder %v399_v46, 8.507059e+37  ;;  %v1661_v54 = vld [vmem:[%s1367_s24 + $0x98] sm:$0xff] }
  0x4e   : > { %v1067_v7 = vpop.eup %1066  ;;  %816 = vst [vmem:[%s1529_s17 + $0x20] sm:$0xff] %v784_v57  ;;  %v388_v58 = vsel %vm385_vm7, %v387_v18, %v383_v6  ;;  %v402_v62 = vor.u32 1.1754944e-38, %v401_v53  ;;  %vm410_vm10 = vweird.f32 %v1494_v21  ;;  %v414_v9 = vand.u32 2147483647, %v1494_v21  ;;  %v1611_v18 = vld [vmem:[%s1367_s24 + $0x88] sm:$0xff] }
  0x4f   : > { %v785_v4 = vmul.f32 %v388_v58, %v1392_v8  ;;  %v391_v5 = vmul.f32 %v1067_v7, %v1490_v22  ;;  %v416_v10 = vand.u32 2147483648, %v1494_v21  ;;  %vm396_vm11 = vweird.f32 %v1067_v7 }
  0x50   : > { %vm425_vm12 = vweird.f32 %v1535_v32  ;;  %v429_v15 = vand.u32 2147483647, %v1535_v32  ;;  %1072 = vpow2.f32 %v953_v59  ;;  %v956_v19 = vmul.f32 -1.442695, %v1590_v63  ;;  %vm1624_vm13 = vmor %vm395_vm8, %vm396_vm11 }
  0x51   : > { %817 = vst [vmem:[%s1529_s17 + $0x28] sm:$0xff] %v785_v4  ;;  %v392_v8 = vsub.f32 1.0, %v391_v5  ;;  %1074 = vpow2.f32 %v954_v60  ;;  %v957_v20 = vmul.f32 -1.442695, %v1593_v3  ;;  %v1069_v23 = vpop.eup %1068  ;;  %v431_v24 = vand.u32 2147483648, %v1535_v32 }
  0x52   : > { %1076 = vpow2.f32 %v955_v40  ;;  %v958_v25 = vmul.f32 -1.442695, %v1600_v11  ;;  %v959_v26 = vmul.f32 -1.442695, %v1603_v14  ;;  %v406_v29 = vmul.f32 %v1069_v23, %v1494_v21 }
  0x53   : > { %v1071_v27 = vpop.eup %1070  ;;  %v393_v28 = vmul.f32 %v1067_v7, %v392_v8  ;;  %1078 = vpow2.f32 %v956_v19  ;;  %v960_v33 = vmul.f32 -1.442695, %v1608_v17  ;;  %vm1628_vm14 = vcmp.eq.f32.partialorder %v414_v9, 8.507059e+37 }
  0x54   : > { %v421_v37 = vmul.f32 %v1071_v27, %v1535_v32  ;;  %1080 = vpow2.f32 %v957_v20  ;;  %v961_v38 = vmul.f32 -1.442695, %v1611_v18  ;;  %v407_v30 = vsub.f32 1.0, %v406_v29  ;;  %v1670_v32 = vld [vmem:[%s1367_s24 + $0xa0] sm:$0xff] }
  0x55   : > { %v394_v34 = vadd.f32 %v1067_v7, %v393_v28  ;;  %vm411_vm15 = vweird.f32 %v1069_v23  ;;  %1082 = vpow2.f32 %v958_v25  ;;  %v417_v41 = vor.u32 1.1754944e-38, %v416_v10 }
  0x56   : > { %v1073_v39 = vpop.eup %1072  ;;  %v422_v22 = vsub.f32 1.0, %v421_v37  ;;  %vm426_vm0 = vweird.f32 %v1071_v27  ;;  %1084 = vpow2.f32 %v959_v26  ;;  %v408_v1 = vmul.f32 %v1069_v23, %v407_v30  ;;  %vm1642_vm1 = vmor %vm410_vm10, %vm411_vm15 }
  0x57   : > { %v1075_v0 = vpop.eup %1074  ;;  %v398_v42 = vsel %vm1624_vm13, %v1067_v7, %v394_v34  ;;  %v1636_v31 = vadd.f32 1.0, %v1073_v39  ;;  %1086 = vpow2.f32 %v960_v33  ;;  %vm1652_vm2 = vmor %vm425_vm12, %vm426_vm0  ;;  %v432_v21 = vor.u32 1.1754944e-38, %v431_v24 }
  0x58   : > { %v1077_v43 = vpop.eup %1076  ;;  %v403_v44 = vsel %vm1584_vm9, %v402_v62, %v398_v42  ;;  %v423_v46 = vmul.f32 %v1071_v27, %v422_v22  ;;  %v1646_v50 = vadd.f32 1.0, %v1075_v0  ;;  %1088 = vpow2.f32 %v961_v38 }
  0x59   : > { %v1079_v51 = vpop.eup %1078  ;;  %v786_v47 = vmul.f32 %v403_v44, %v1398_v12  ;;  %v409_v52 = vadd.f32 %v1069_v23, %v408_v1  ;;  %1090 = vrcp.f32 %v1636_v31  ;;  %vm1663_vm4 = vcmp.eq.f32.partialorder %v429_v15, 8.507059e+37 }
  0x5a   : > { %v1081_v56 = vpop.eup %1080  ;;  %v424_v57 = vadd.f32 %v1071_v27, %v423_v46  ;;  %v444_v12 = vand.u32 2147483647, %v1636_v31  ;;  %1092 = vrcp.f32 %v1646_v50  ;;  %v446_v40 = vand.u32 2147483648, %v1636_v31 }
  0x5b   : > { %v1083_v60 = vpop.eup %1082  ;;  %818 = vst [vmem:[%s1529_s17 + $0x30] sm:$0xff] %v786_v47  ;;  %v413_v6 = vsel %vm1642_vm1, %v1069_v23, %v409_v52  ;;  %v459_v7 = vand.u32 2147483647, %v1646_v50  ;;  %v461_v58 = vand.u32 2147483648, %v1646_v50  ;;  %v1683_v5 = vmul.f32 -1.442695, %v1658_v2 }
  0x5c   : > { %v1085_v61 = vpop.eup %1084  ;;  %v418_v62 = vsel %vm1628_vm14, %v417_v41, %v413_v6  ;;  %v428_v4 = vsel %vm1652_vm2, %v1071_v27, %v424_v57  ;;  %v1686_v9 = vmul.f32 -1.442695, %v1661_v54  ;;  %vm440_vm3 = vweird.f32 %v1636_v31 }
  0x5d   : > { %v1087_v10 = vpop.eup %1086  ;;  %v787_v15 = vmul.f32 %v418_v62, %v1401_v13  ;;  %v433_v8 = vsel %vm1663_vm4, %v432_v21, %v428_v4  ;;  %v1693_v19 = vmul.f32 -1.442695, %v1670_v32  ;;  %vm455_vm5 = vweird.f32 %v1646_v50 }
  0x5e   : > { %v1089_v20 = vpop.eup %1088  ;;  %v788_v23 = vmul.f32 %v433_v8, %v1406_v16  ;;  %v1697_v24 = vadd.f32 1.0, %v1077_v43  ;;  %v1699_v25 = vadd.f32 1.0, %v1079_v51  ;;  %vm1702_vm6 = vcmp.eq.f32.partialorder %v444_v12, 8.507059e+37 }
  0x5f   : > { %v1091_v26 = vpop.eup %1090  ;;  %819 = vst [vmem:[%s1529_s17 + $0x38] sm:$0xff] %v787_v15  ;;  %v447_v27 = vor.u32 1.1754944e-38, %v446_v40  ;;  %vm1706_vm7 = vcmp.eq.f32.partialorder %v459_v7, 8.507059e+37  ;;  %v462_v29 = vor.u32 1.1754944e-38, %v461_v58  ;;  %v1713_v35 = vadd.f32 1.0, %v1081_v56 }
  0x60   : > { %v1093_v33 = vpop.eup %1092  ;;  %820 = vst [vmem:[%s1529_s17 + $0x40] sm:$0xff] %v788_v23  ;;  %v436_v16 = vmul.f32 %v1091_v26, %v1636_v31  ;;  %1094 = vrcp.f32 %v1697_v24  ;;  %v1715_v36 = vadd.f32 1.0, %v1083_v60  ;;  %v474_v38 = vand.u32 2147483647, %v1697_v24 }
  0x61   : > { %v451_v37 = vmul.f32 %v1093_v33, %v1646_v50  ;;  %v476_v34 = vand.u32 2147483648, %v1697_v24  ;;  %v1720_v30 = vadd.f32 1.0, %v1085_v61  ;;  %vm441_vm8 = vweird.f32 %v1091_v26 }
  0x62   : > { %v437_v39 = vsub.f32 1.0, %v436_v16  ;;  %1096 = vrcp.f32 %v1699_v25  ;;  %v1723_v41 = vadd.f32 1.0, %v1087_v10  ;;  %vm456_vm9 = vweird.f32 %v1093_v33  ;;  %vm1733_vm11 = vmor %vm440_vm3, %vm441_vm8 }
  0x63   : > { %v452_v22 = vsub.f32 1.0, %v451_v37  ;;  %v489_v0 = vand.u32 2147483647, %v1699_v25  ;;  %v491_v42 = vand.u32 2147483648, %v1699_v25  ;;  %vm470_vm10 = vweird.f32 %v1697_v24  ;;  %vm1744_vm14 = vmor %vm455_vm5, %vm456_vm9 }
  0x64   : > { %v438_v1 = vmul.f32 %v1091_v26, %v437_v39  ;;  %1098 = vrcp.f32 %v1713_v35  ;;  %v1729_v43 = vadd.f32 1.0, %v1089_v20  ;;  %vm1737_vm12 = vcmp.eq.f32.partialorder %v474_v38, 8.507059e+37 }
  0x65   : > { %v453_v45 = vmul.f32 %v1093_v33, %v452_v22  ;;  %v477_v51 = vor.u32 1.1754944e-38, %v476_v34  ;;  %vm485_vm13 = vweird.f32 %v1699_v25  ;;  %vm500_vm15 = vweird.f32 %v1713_v35 }
  0x66   : > { %v1095_v47 = vpop.eup %1094  ;;  %v439_v52 = vadd.f32 %v1091_v26, %v438_v1  ;;  %v504_v31 = vand.u32 2147483647, %v1713_v35  ;;  %1100 = vrcp.f32 %v1715_v36  ;;  %vm1752_vm0 = vcmp.eq.f32.partialorder %v489_v0, 8.507059e+37 }
  0x67   : > { %v454_v21 = vadd.f32 %v1093_v33, %v453_v45  ;;  %v466_v56 = vmul.f32 %v1095_v47, %v1697_v24  ;;  %v492_v59 = vor.u32 1.1754944e-38, %v491_v42  ;;  %v506_v50 = vand.u32 2147483648, %v1713_v35 }
  0x68   : > { %v1097_v12 = vpop.eup %1096  ;;  %v443_v60 = vsel %vm1733_vm11, %v1091_v26, %v439_v52  ;;  %vm471_vm1 = vweird.f32 %v1095_v47  ;;  %vm515_vm2 = vweird.f32 %v1715_v36  ;;  %v519_v6 = vand.u32 2147483647, %v1715_v36 }
  0x69   : > { %v448_v40 = vsel %vm1702_vm6, %v447_v27, %v443_v60  ;;  %v458_v7 = vsel %vm1744_vm14, %v1093_v33, %v454_v21  ;;  %v467_v58 = vsub.f32 1.0, %v466_v56  ;;  %v481_v61 = vmul.f32 %v1097_v12, %v1699_v25  ;;  %vm1779_vm5 = vmor %vm470_vm10, %vm471_vm1 }
  0x6a   : > { %v1099_v62 = vpop.eup %1098  ;;  %v789_v4 = vmul.f32 %v448_v40, %v1545_v48  ;;  %v463_v10 = vsel %vm1706_vm7, %v462_v29, %v458_v7  ;;  %vm486_vm4 = vweird.f32 %v1097_v12  ;;  %vm1769_vm3 = vcmp.eq.f32.partialorder %v504_v31, 8.507059e+37 }
  0x6b   : > { %v790_v8 = vmul.f32 %v463_v10, %v1548_v49  ;;  %v468_v20 = vmul.f32 %v1095_v47, %v467_v58  ;;  %v482_v23 = vsub.f32 1.0, %v481_v61  ;;  %v496_v26 = vmul.f32 %v1099_v62, %v1713_v35  ;;  %vm1791_vm7 = vmor %vm485_vm13, %vm486_vm4  ;;  %v1846_v58 = vld [vmem:[%s1367_s24 + $0xa8] sm:$0xff] }
  0x6c   : > { %v1101_v13 = vpop.eup %1100  ;;  %821 = vst [vmem:[%s1529_s17 + $0x48] sm:$0xff] %v789_v4  ;;  %vm501_vm6 = vweird.f32 %v1099_v62  ;;  %v521_v27 = vand.u32 2147483648, %v1715_v36  ;;  %1102 = vrcp.f32 %v1720_v30  ;;  %v534_v49 = vand.u32 2147483647, %v1720_v30 }
  0x6d   : > { %822 = vst [vmem:[%s1529_s17 + $0x50] sm:$0xff] %v790_v8  ;;  %v469_v28 = vadd.f32 %v1095_v47, %v468_v20  ;;  %v483_v29 = vmul.f32 %v1097_v12, %v482_v23  ;;  %v497_v33 = vsub.f32 1.0, %v496_v26  ;;  %v511_v16 = vmul.f32 %v1101_v13, %v1715_v36  ;;  %vm1807_vm10 = vmor %vm500_vm15, %vm501_vm6  ;;  %v1858_v8 = vld [vmem:[%s1367_s24 + $0xb0] sm:$0xff]  ;;  %v1861_v20 = vld [vmem:[%s1367_s24 + $0xb8] sm:$0xff] }
  0x6e   : > { %v507_v37 = vor.u32 1.1754944e-38, %v506_v50  ;;  %vm516_vm8 = vweird.f32 %v1101_v13  ;;  %vm1795_vm9 = vcmp.eq.f32.partialorder %v519_v6, 8.507059e+37  ;;  %1104 = vrcp.f32 %v1723_v41 }
  0x6f   : > { %v473_v34 = vsel %vm1779_vm5, %v1095_v47, %v469_v28  ;;  %v484_v39 = vadd.f32 %v1097_v12, %v483_v29  ;;  %v498_v22 = vmul.f32 %v1099_v62, %v497_v33  ;;  %v512_v0 = vsub.f32 1.0, %v511_v16  ;;  %vm1825_vm13 = vmor %vm515_vm2, %vm516_vm8 }
  0x70   : > { %v478_v25 = vsel %vm1737_vm12, %v477_v51, %v473_v34  ;;  %v522_v1 = vor.u32 1.1754944e-38, %v521_v27  ;;  %vm530_vm11 = vweird.f32 %v1720_v30  ;;  %v536_v44 = vand.u32 2147483648, %v1720_v30 }
  0x71   : > { %v791_v45 = vmul.f32 %v478_v25, %v1565_v55  ;;  %v488_v47 = vsel %vm1791_vm7, %v1097_v12, %v484_v39  ;;  %v499_v46 = vadd.f32 %v1099_v62, %v498_v22  ;;  %v513_v51 = vmul.f32 %v1101_v13, %v512_v0  ;;  %v1898_v39 = vld [vmem:[%s1367_s24 + $0xc8] sm:$0xff] }
  0x72   : > { %vm1816_vm12 = vcmp.eq.f32.partialorder %v534_v49, 8.507059e+37  ;;  %v1103_v35 = vpop.eup %1102  ;;  %v493_v53 = vsel %vm1752_vm0, %v492_v59, %v488_v47  ;;  %v549_v55 = vand.u32 2147483647, %v1723_v41  ;;  %v551_v21 = vand.u32 2147483648, %v1723_v41 }
  0x73   : > { %1106 = vrcp.f32 %v1729_v43  ;;  %823 = vst [vmem:[%s1529_s17 + $0x58] sm:$0xff] %v791_v45  ;;  %v792_v56 = vmul.f32 %v493_v53, %v1590_v63  ;;  %v503_v57 = vsel %vm1807_vm10, %v1099_v62, %v499_v46  ;;  %v514_v59 = vadd.f32 %v1101_v13, %v513_v51 }
  0x74   : > { %v526_v36 = vmul.f32 %v1103_v35, %v1720_v30  ;;  %v1105_v50 = vpop.eup %1104  ;;  %v508_v12 = vsel %vm1769_vm3, %v507_v37, %v503_v57  ;;  %vm531_vm14 = vweird.f32 %v1103_v35  ;;  %v537_v60 = vor.u32 1.1754944e-38, %v536_v44 }
  0x75   : > { %vm545_vm15 = vweird.f32 %v1723_v41  ;;  %824 = vst [vmem:[%s1529_s17 + $0x60] sm:$0xff] %v792_v56  ;;  %v793_v63 = vmul.f32 %v508_v12, %v1593_v3  ;;  %v518_v6 = vsel %vm1825_vm13, %v1101_v13, %v514_v59  ;;  %v541_v7 = vmul.f32 %v1105_v50, %v1723_v41  ;;  %vm1866_vm2 = vmor %vm530_vm11, %vm531_vm14  ;;  %v1890_v41 = vld [vmem:[%s1367_s24 + $0xc0] sm:$0xff] }
  0x76   : > { %v527_v40 = vsub.f32 1.0, %v526_v36  ;;  %v523_v61 = vsel %vm1795_vm9, %v522_v1, %v518_v6  ;;  %vm546_vm0 = vweird.f32 %v1105_v50  ;;  %vm1850_vm1 = vcmp.eq.f32.partialorder %v549_v55, 8.507059e+37 }
  0x77   : > { %v552_v4 = vor.u32 1.1754944e-38, %v551_v21  ;;  %825 = vst [vmem:[%s1529_s17 + $0x68] sm:$0xff] %v793_v63  ;;  %v794_v3 = vmul.f32 %v523_v61, %v1600_v11  ;;  %v542_v15 = vsub.f32 1.0, %v541_v7  ;;  %1108 = vpow2.f32 %v1683_v5  ;;  %vm1880_vm3 = vmor %vm545_vm15, %vm546_vm0 }
  0x78   : > { %v528_v10 = vmul.f32 %v1103_v35, %v527_v40  ;;  %vm560_vm4 = vweird.f32 %v1729_v43  ;;  %v564_v11 = vand.u32 2147483647, %v1729_v43  ;;  %1110 = vpow2.f32 %v1686_v9 }
  0x79   : > { %v1107_v23 = vpop.eup %1106  ;;  %v965_v5 = vmul.f32 -1.442695, %v1846_v58  ;;  %826 = vst [vmem:[%s1529_s17 + $0x70] sm:$0xff] %v794_v3  ;;  %v543_v48 = vmul.f32 %v1105_v50, %v542_v15  ;;  %v566_v30 = vand.u32 2147483648, %v1729_v43  ;;  %1112 = vpow2.f32 %v1693_v19 }
  0x7a   : > { %v529_v13 = vadd.f32 %v1103_v35, %v528_v10  ;;  %v556_v27 = vmul.f32 %v1107_v23, %v1729_v43  ;;  %vm561_vm5 = vweird.f32 %v1107_v23  ;;  %v966_v9 = vmul.f32 -1.442695, %v1858_v8 }
  0x7b   : > { %v967_v28 = vmul.f32 -1.442695, %v1861_v20  ;;  %v544_v33 = vadd.f32 %v1105_v50, %v543_v48  ;;  %1114 = vpow2.f32 %v965_v5  ;;  %vm1905_vm6 = vmor %vm560_vm4, %vm561_vm5  ;;  %v968_v1 = vmul.f32 -1.442695, %v1890_v41 }
  0x7c   : > { %v533_v29 = vsel %vm1866_vm2, %v1103_v35, %v529_v13  ;;  %v557_v16 = vsub.f32 1.0, %v556_v27  ;;  %1116 = vpow2.f32 %v966_v9  ;;  %vm565_vm7 = vcmp.eq.f32.partialorder %v564_v11, 8.507059e+37 }
  0x7d   : > { %v538_v24 = vsel %vm1816_vm12, %v537_v60, %v533_v29  ;;  %v1109_v37 = vpop.eup %1108  ;;  %v548_v38 = vsel %vm1880_vm3, %v1105_v50, %v544_v33  ;;  %1118 = vpow2.f32 %v967_v28  ;;  %v969_v43 = vmul.f32 -1.442695, %v1898_v39 }
  0x7e   : > { %v795_v19 = vmul.f32 %v538_v24, %v1603_v14  ;;  %v558_v34 = vmul.f32 %v1107_v23, %v557_v16  ;;  %v1111_v22 = vpop.eup %1110  ;;  %v553_v0 = vsel %vm1850_vm1, %v552_v4, %v548_v38  ;;  %v567_v14 = vor.u32 1.1754944e-38, %v566_v30 }
  0x7f   : > { %v1909_v42 = vadd.f32 1.0, %v1109_v37  ;;  %v796_v44 = vmul.f32 %v553_v0, %v1608_v17  ;;  %v1914_v47 = vadd.f32 1.0, %v1111_v22  ;;  %v1113_v46 = vpop.eup %1112  ;;  %v1925_v17 = vld [vmem:[%s1367_s24 + $0xd0] sm:$0xff] }
  0x80   : > { %827 = vst [vmem:[%s1529_s17 + $0x78] sm:$0xff] %v795_v19  ;;  %v559_v45 = vadd.f32 %v1107_v23, %v558_v34  ;;  %v1930_v36 = vadd.f32 1.0, %v1113_v46  ;;  %v970_v12 = vmul.f32 -1.442695, %v1925_v17 }
  0x81   : > { %1120 = vrcp.f32 %v1909_v42  ;;  %v1115_v51 = vpop.eup %1114  ;;  %828 = vst [vmem:[%s1529_s17 + $0x80] sm:$0xff] %v796_v44  ;;  %v579_v35 = vand.u32 2147483647, %v1909_v42  ;;  %v581_v53 = vand.u32 2147483648, %v1909_v42  ;;  %v594_v21 = vand.u32 2147483647, %v1914_v47 }
  0x82   : > { %v563_v52 = vsel %vm1905_vm6, %v1107_v23, %v559_v45  ;;  %1122 = vrcp.f32 %v1914_v47  ;;  %v1117_v31 = vpop.eup %1116  ;;  %v596_v59 = vand.u32 2147483648, %v1914_v47  ;;  %v1932_v50 = vadd.f32 1.0, %v1115_v51 }
  0x83   : > { %v568_v55 = vsel %vm565_vm7, %v567_v14, %v563_v52  ;;  %1124 = vpow2.f32 %v968_v1  ;;  %v1119_v56 = vpop.eup %1118  ;;  %vm575_vm8 = vweird.f32 %v1909_v42  ;;  %vm590_vm9 = vweird.f32 %v1914_v47 }
  0x84   : > { %v797_v57 = vmul.f32 %v568_v55, %v1611_v18  ;;  %1126 = vpow2.f32 %v969_v43  ;;  %vm1938_vm10 = vcmp.eq.f32.partialorder %v579_v35, 8.507059e+37  ;;  %v582_v63 = vor.u32 1.1754944e-38, %v581_v53 }
  0x85   : > { %1128 = vrcp.f32 %v1930_v36  ;;  %v611_v18 = vand.u32 2147483648, %v1930_v36  ;;  %v1944_v6 = vadd.f32 1.0, %v1117_v31  ;;  %vm1946_vm11 = vcmp.eq.f32.partialorder %v594_v21, 8.507059e+37 }
  0x86   : > { %829 = vst [vmem:[%s1529_s17 + $0x88] sm:$0xff] %v797_v57  ;;  %v609_v61 = vand.u32 2147483647, %v1930_v36  ;;  %1130 = vrcp.f32 %v1932_v50  ;;  %v1952_v62 = vadd.f32 1.0, %v1119_v56  ;;  %v597_v10 = vor.u32 1.1754944e-38, %v596_v59 }
  0x87   : > { %v1121_v40 = vpop.eup %1120  ;;  %v624_v15 = vand.u32 2147483647, %v1932_v50  ;;  %v626_v23 = vand.u32 2147483648, %v1932_v50  ;;  %vm605_vm12 = vweird.f32 %v1930_v36  ;;  %vm620_vm13 = vweird.f32 %v1932_v50 }
  0x88   : > { %v1123_v4 = vpop.eup %1122  ;;  %v571_v3 = vmul.f32 %v1121_v40, %v1909_v42  ;;  %1132 = vpow2.f32 %v970_v12  ;;  %vm576_vm14 = vweird.f32 %v1121_v40  ;;  %v612_v13 = vor.u32 1.1754944e-38, %v611_v18 }
  0x89   : > { %v1125_v26 = vpop.eup %1124  ;;  %v586_v11 = vmul.f32 %v1123_v4, %v1914_v47  ;;  %1134 = vrcp.f32 %v1944_v6  ;;  %vm591_vm15 = vweird.f32 %v1123_v4  ;;  %vm1961_vm0 = vcmp.eq.f32.partialorder %v609_v61, 8.507059e+37  ;;  %vm1975_vm4 = vmor %vm575_vm8, %vm576_vm14 }
  0x8a   : > { %v572_v5 = vsub.f32 1.0, %v571_v3  ;;  %v1127_v48 = vpop.eup %1126  ;;  %v639_v49 = vand.u32 2147483647, %v1944_v6  ;;  %1136 = vrcp.f32 %v1952_v62  ;;  %vm1967_vm1 = vcmp.eq.f32.partialorder %v624_v15, 8.507059e+37  ;;  %vm1985_vm5 = vmor %vm590_vm9, %vm591_vm15 }
  0x8b   : > { %v587_v27 = vsub.f32 1.0, %v586_v11  ;;  %v1129_v9 = vpop.eup %1128  ;;  %v627_v33 = vor.u32 1.1754944e-38, %v626_v23  ;;  %vm635_vm2 = vweird.f32 %v1944_v6  ;;  %v641_v38 = vand.u32 2147483648, %v1944_v6 }
  0x8c   : > { %v573_v28 = vmul.f32 %v1121_v40, %v572_v5  ;;  %v1131_v16 = vpop.eup %1130  ;;  %v601_v19 = vmul.f32 %v1129_v9, %v1930_v36  ;;  %vm650_vm3 = vweird.f32 %v1952_v62  ;;  %v654_v25 = vand.u32 2147483647, %v1952_v62 }
  0x8d   : > { %v588_v37 = vmul.f32 %v1123_v4, %v587_v27  ;;  %v616_v0 = vmul.f32 %v1131_v16, %v1932_v50  ;;  %v656_v14 = vand.u32 2147483648, %v1952_v62  ;;  %vm606_vm6 = vweird.f32 %v1129_v9 }
  0x8e   : > { %v574_v34 = vadd.f32 %v1121_v40, %v573_v28  ;;  %v1133_v42 = vpop.eup %1132  ;;  %v602_v44 = vsub.f32 1.0, %v601_v19  ;;  %vm621_vm7 = vweird.f32 %v1131_v16  ;;  %vm1992_vm8 = vcmp.eq.f32.partialorder %v639_v49, 8.507059e+37  ;;  %vm2013_vm9 = vmor %vm605_vm12, %vm606_vm6  ;;  %v2081_v19 = vld [vmem:[%s1367_s24 + $0xe8] sm:$0xff] }
  0x8f   : > { %v589_v1 = vadd.f32 %v1123_v4, %v588_v37  ;;  %v1135_v47 = vpop.eup %1134  ;;  %v617_v43 = vsub.f32 1.0, %v616_v0  ;;  %v1998_v51 = vadd.f32 1.0, %v1125_v26  ;;  %v2000_v52 = vadd.f32 1.0, %v1127_v48  ;;  %vm2021_vm14 = vmor %vm620_vm13, %vm621_vm7  ;;  %v2050_v48 = vld [vmem:[%s1367_s24 + $0xd8] sm:$0xff]  ;;  %v2078_v37 = vld [vmem:[%s1367_s24 + $0xe0] sm:$0xff] }
  0x90   : > { %v578_v46 = vsel %vm1975_vm4, %v1121_v40, %v574_v34  ;;  %v1137_v35 = vpop.eup %1136  ;;  %v603_v55 = vmul.f32 %v1129_v9, %v602_v44  ;;  %v631_v21 = vmul.f32 %v1135_v47, %v1944_v6  ;;  %v642_v7 = vor.u32 1.1754944e-38, %v641_v38  ;;  %v2086_v0 = vld [vmem:[%s1367_s24 + $0xf0] sm:$0xff] }
  0x91   : > { %v583_v53 = vsel %vm1938_vm10, %v582_v63, %v578_v46  ;;  %v593_v31 = vsel %vm1985_vm5, %v1123_v4, %v589_v1  ;;  %v618_v12 = vmul.f32 %v1131_v16, %v617_v43  ;;  %vm636_vm10 = vweird.f32 %v1135_v47  ;;  %v2092_v1 = vld [vmem:[%s1367_s24 + $0xf8] sm:$0xff] }
  0x92   : > { %v798_v56 = vmul.f32 %v583_v53, %v1658_v2  ;;  %v598_v57 = vsel %vm1946_vm11, %v597_v10, %v593_v31  ;;  %v604_v63 = vadd.f32 %v1129_v9, %v603_v55  ;;  %v632_v18 = vsub.f32 1.0, %v631_v21  ;;  %vm2040_vm12 = vmor %vm635_vm2, %vm636_vm10 }
  0x93   : > { %v799_v60 = vmul.f32 %v598_v57, %v1661_v54  ;;  %v646_v40 = vmul.f32 %v1137_v35, %v1952_v62  ;;  %v619_v36 = vadd.f32 %v1131_v16, %v618_v12  ;;  %1138 = vrcp.f32 %v1998_v51 }
  0x94   : > { %830 = vst [vmem:[%s1529_s17 + $0x90] sm:$0xff] %v798_v56  ;;  %v2028_v61 = vadd.f32 1.0, %v1133_v42  ;;  %v608_v54 = vsel %vm2013_vm9, %v1129_v9, %v604_v63  ;;  %v633_v50 = vmul.f32 %v1135_v47, %v632_v18  ;;  %vm651_vm11 = vweird.f32 %v1137_v35 }
  0x95   : > { %831 = vst [vmem:[%s1529_s17 + $0x98] sm:$0xff] %v799_v60  ;;  %v647_v4 = vsub.f32 1.0, %v646_v40  ;;  %v613_v3 = vsel %vm1961_vm0, %v612_v13, %v608_v54  ;;  %v623_v10 = vsel %vm2021_vm14, %v1131_v16, %v619_v36  ;;  %v669_v23 = vand.u32 2147483647, %v1998_v51  ;;  %vm2055_vm13 = vmor %vm650_vm3, %vm651_vm11 }
  0x96   : > { %1140 = vrcp.f32 %v2000_v52  ;;  %v800_v26 = vmul.f32 %v613_v3, %v1670_v32  ;;  %v628_v11 = vsel %vm1967_vm1, %v627_v33, %v623_v10  ;;  %v634_v5 = vadd.f32 %v1135_v47, %v633_v50 }
  0x97   : > { %v648_v13 = vmul.f32 %v1137_v35, %v647_v4  ;;  %v801_v6 = vmul.f32 %v628_v11, %v1846_v58  ;;  %v657_v30 = vor.u32 1.1754944e-38, %v656_v14  ;;  %v671_v49 = vand.u32 2147483648, %v1998_v51 }
  0x98   : > { %832 = vst [vmem:[%s1529_s17 + $0xa0] sm:$0xff] %v800_v26  ;;  %v638_v32 = vsel %vm2040_vm12, %v1135_v47, %v634_v5  ;;  %vm655_vm15 = vcmp.eq.f32.partialorder %v654_v25, 8.507059e+37  ;;  %vm665_vm0 = vweird.f32 %v1998_v51  ;;  %1142 = vrcp.f32 %v2028_v61 }
  0x99   : > { %v649_v9 = vadd.f32 %v1137_v35, %v648_v13  ;;  %v1139_v28 = vpop.eup %1138  ;;  %833 = vst [vmem:[%s1529_s17 + $0xa8] sm:$0xff] %v801_v6  ;;  %v643_v58 = vsel %vm1992_vm8, %v642_v7, %v638_v32  ;;  %v971_v62 = vmul.f32 -1.442695, %v2050_v48  ;;  %vm2073_vm1 = vcmp.eq.f32.partialorder %v669_v23, 8.507059e+37 }
  0x9a   : > { %v802_v29 = vmul.f32 %v643_v58, %v1858_v8  ;;  %v661_v16 = vmul.f32 %v1139_v28, %v1998_v51  ;;  %v672_v22 = vor.u32 1.1754944e-38, %v671_v49  ;;  %vm680_vm2 = vweird.f32 %v2000_v52 }
  0x9b   : > { %v653_v33 = vsel %vm2055_vm13, %v1137_v35, %v649_v9  ;;  %v684_v8 = vand.u32 2147483647, %v2000_v52  ;;  %vm666_vm4 = vweird.f32 %v1139_v28  ;;  %v686_v44 = vand.u32 2147483648, %v2000_v52 }
  0x9c   : > { %v1141_v38 = vpop.eup %1140  ;;  %v658_v34 = vsel %vm655_vm15, %v657_v30, %v653_v33  ;;  %834 = vst [vmem:[%s1529_s17 + $0xb0] sm:$0xff] %v802_v29  ;;  %v662_v14 = vsub.f32 1.0, %v661_v16  ;;  %1144 = vpow2.f32 %v971_v62  ;;  %v972_v45 = vmul.f32 -1.442695, %v2078_v37  ;;  %vm2101_vm5 = vmor %vm665_vm0, %vm666_vm4 }
  0x9d   : > { %v803_v25 = vmul.f32 %v658_v34, %v1861_v20  ;;  %v676_v42 = vmul.f32 %v1141_v38, %v2000_v52  ;;  %v973_v47 = vmul.f32 -1.442695, %v2081_v19  ;;  %vm681_vm3 = vweird.f32 %v1141_v38 }
  0x9e   : > { %v663_v46 = vmul.f32 %v1139_v28, %v662_v14  ;;  %v974_v35 = vmul.f32 -1.442695, %v2086_v0  ;;  %v1143_v20 = vpop.eup %1142  ;;  %vm695_vm6 = vweird.f32 %v2028_v61  ;;  %v699_v31 = vand.u32 2147483647, %v2028_v61  ;;  %vm2115_vm8 = vmor %vm680_vm2, %vm681_vm3 }
  0x9f   : > { %835 = vst [vmem:[%s1529_s17 + $0xb8] sm:$0xff] %v803_v25  ;;  %v677_v43 = vsub.f32 1.0, %v676_v42  ;;  %1146 = vpow2.f32 %v972_v45  ;;  %v975_v55 = vmul.f32 -1.442695, %v2092_v1  ;;  %vm2108_vm7 = vcmp.eq.f32.partialorder %v684_v8, 8.507059e+37 }
  0xa0   : > { %v664_v21 = vadd.f32 %v1139_v28, %v663_v46  ;;  %v691_v59 = vmul.f32 %v1143_v20, %v2028_v61  ;;  %v687_v12 = vor.u32 1.1754944e-38, %v686_v44  ;;  %vm696_vm9 = vweird.f32 %v1143_v20 }
  0xa1   : > { %v678_v56 = vmul.f32 %v1141_v38, %v677_v43  ;;  %v701_v60 = vand.u32 2147483648, %v2028_v61  ;;  %1148 = vpow2.f32 %v973_v47  ;;  %vm697_vm10 = vmor %vm695_vm6, %vm696_vm9  ;;  %vm700_vm14 = vcmp.eq.f32.partialorder %v699_v31, 8.507059e+37 }
  0xa2   : > { %v668_v63 = vsel %vm2101_vm5, %v1139_v28, %v664_v21  ;;  %v692_v18 = vsub.f32 1.0, %v691_v59  ;;  %1150 = vpow2.f32 %v974_v35  ;;  %v1145_v40 = vpop.eup %1144 }
  0xa3   : > { %v679_v2 = vadd.f32 %v1141_v38, %v678_v56  ;;  %v673_v52 = vsel %vm2073_vm1, %v672_v22, %v668_v63  ;;  %1152 = vpow2.f32 %v975_v55  ;;  %v295_v50 = vadd.f32 1.0, %v1145_v40 }
  0xa4   : > { %v804_v36 = vmul.f32 %v673_v52, %v1890_v41  ;;  %v693_v54 = vmul.f32 %v1143_v20, %v692_v18  ;;  %v702_v10 = vor.u32 1.1754944e-38, %v701_v60 }
  0xa5   : > { %v683_v7 = vsel %vm2115_vm8, %v1141_v38, %v679_v2  ;;  %v1147_v4 = vpop.eup %1146  ;;  %1154 = vrcp.f32 %v295_v50  ;;  %v714_v49 = vand.u32 2147483647, %v295_v50  ;;  %vm710_vm11 = vweird.f32 %v295_v50 }
  0xa6   : > { %v688_v3 = vsel %vm2108_vm7, %v687_v12, %v683_v7  ;;  %836 = vst [vmem:[%s1529_s17 + $0xc0] sm:$0xff] %v804_v36  ;;  %v694_v41 = vadd.f32 %v1143_v20, %v693_v54  ;;  %v296_v26 = vadd.f32 1.0, %v1147_v4 }
  0xa7   : > { %v805_v15 = vmul.f32 %v688_v3, %v1898_v39  ;;  %v1149_v23 = vpop.eup %1148  ;;  %v716_v39 = vand.u32 2147483648, %v295_v50  ;;  %vm2143_vm13 = vcmp.eq.f32.partialorder %v714_v49, 8.507059e+37 }
  0xa8   : > { %v1151_v11 = vpop.eup %1150  ;;  %v698_v5 = vsel %vm697_vm10, %v1143_v20, %v694_v41  ;;  %v297_v13 = vadd.f32 1.0, %v1149_v23  ;;  %1156 = vrcp.f32 %v296_v26  ;;  %v729_v58 = vand.u32 2147483647, %v296_v26 }
  0xa9   : > { %837 = vst [vmem:[%s1529_s17 + $0xc8] sm:$0xff] %v805_v15  ;;  %v1153_v6 = vpop.eup %1152  ;;  %v703_v27 = vsel %vm700_vm14, %v702_v10, %v698_v5  ;;  %v2137_v32 = vadd.f32 1.0, %v1151_v11  ;;  %v731_v62 = vand.u32 2147483648, %v296_v26  ;;  %v717_v38 = vor.u32 1.1754944e-38, %v716_v39 }
  0xaa   : > { %v806_v61 = vmul.f32 %v703_v27, %v1925_v17  ;;  %1158 = vrcp.f32 %v297_v13  ;;  %v2139_v9 = vadd.f32 1.0, %v1153_v6  ;;  %v744_v29 = vand.u32 2147483647, %v297_v13 }
  0xab   : > { %v1155_v30 = vpop.eup %1154  ;;  %1160 = vrcp.f32 %v2137_v32  ;;  %v746_v17 = vand.u32 2147483648, %v297_v13  ;;  %vm725_vm15 = vweird.f32 %v296_v26  ;;  %vm2147_vm0 = vcmp.eq.f32.partialorder %v729_v58, 8.507059e+37 }
  0xac   : > { %838 = vst [vmem:[%s1529_s17 + $0xd0] sm:$0xff] %v806_v61  ;;  %v706_v28 = vmul.f32 %v1155_v30, %v295_v50  ;;  %vm711_vm12 = vweird.f32 %v1155_v30  ;;  %1162 = vrcp.f32 %v2139_v9  ;;  %v732_v14 = vor.u32 1.1754944e-38, %v731_v62 }
  0xad   : > { %vm740_vm1 = vweird.f32 %v297_v13  ;;  %vm2152_vm2 = vmor %vm710_vm11, %vm711_vm12  ;;  %vm2156_vm3 = vcmp.eq.f32.partialorder %v744_v29, 8.507059e+37  ;;  %v747_v43 = vor.u32 1.1754944e-38, %v746_v17  ;;  %vm755_vm5 = vweird.f32 %v2137_v32 }
  0xae   : > { %v1157_v33 = vpop.eup %1156  ;;  %v707_v16 = vsub.f32 1.0, %v706_v28  ;;  %v759_v35 = vand.u32 2147483647, %v2137_v32  ;;  %v761_v55 = vand.u32 2147483648, %v2137_v32  ;;  %vm770_vm8 = vweird.f32 %v2139_v9 }
  0xaf   : > { %v721_v34 = vmul.f32 %v1157_v33, %v296_v26  ;;  %vm726_vm4 = vweird.f32 %v1157_v33  ;;  %v774_v51 = vand.u32 2147483647, %v2139_v9  ;;  %v776_v36 = vand.u32 2147483648, %v2139_v9 }
  0xb0   : > { %v1159_v22 = vpop.eup %1158  ;;  %v708_v8 = vmul.f32 %v1155_v30, %v707_v16  ;;  %vm2166_vm7 = vmor %vm725_vm15, %vm726_vm4  ;;  %v762_v41 = vor.u32 1.1754944e-38, %v761_v55  ;;  %vm760_vm12 = vcmp.eq.f32.partialorder %v759_v35, 8.507059e+37 }
  0xb1   : > { %v722_v44 = vsub.f32 1.0, %v721_v34  ;;  %v736_v45 = vmul.f32 %v1159_v22, %v297_v13  ;;  %v1161_v20 = vpop.eup %1160  ;;  %vm741_vm6 = vweird.f32 %v1159_v22  ;;  %vm775_vm15 = vcmp.eq.f32.partialorder %v774_v51, 8.507059e+37 }
  0xb2   : > { %v709_v46 = vadd.f32 %v1155_v30, %v708_v8  ;;  %v1163_v21 = vpop.eup %1162  ;;  %v751_v59 = vmul.f32 %v1161_v20, %v2137_v32  ;;  %vm2179_vm9 = vmor %vm740_vm1, %vm741_vm6  ;;  %vm756_vm10 = vweird.f32 %v1161_v20 }
  0xb3   : > { %v723_v53 = vmul.f32 %v1157_v33, %v722_v44  ;;  %v737_v31 = vsub.f32 1.0, %v736_v45  ;;  %v766_v2 = vmul.f32 %v1163_v21, %v2139_v9  ;;  %vm771_vm14 = vweird.f32 %v1163_v21  ;;  %vm2197_vm11 = vmor %vm755_vm5, %vm756_vm10 }
  0xb4   : > { %v713_v56 = vsel %vm2152_vm2, %v1155_v30, %v709_v46  ;;  %v752_v52 = vsub.f32 1.0, %v751_v59 }
  0xb5   : > { %v718_v12 = vsel %vm2143_vm13, %v717_v38, %v713_v56  ;;  %v724_v60 = vadd.f32 %v1157_v33, %v723_v53  ;;  %v738_v63 = vmul.f32 %v1159_v22, %v737_v31  ;;  %v767_v50 = vsub.f32 1.0, %v766_v2  ;;  %vm772_vm13 = vmor %vm770_vm8, %vm771_vm14 }
  0xb6   : > { %v807_v18 = vmul.f32 %v718_v12, %v2050_v48  ;;  %v753_v4 = vmul.f32 %v1161_v20, %v752_v52 }
  0xb7   : > { %v728_v7 = vsel %vm2166_vm7, %v1157_v33, %v724_v60  ;;  %v739_v54 = vadd.f32 %v1159_v22, %v738_v63  ;;  %v768_v23 = vmul.f32 %v1163_v21, %v767_v50 }
  0xb8   : > { %839 = vst [vmem:[%s1529_s17 + $0xd8] sm:$0xff] %v807_v18  ;;  %v733_v48 = vsel %vm2147_vm0, %v732_v14, %v728_v7  ;;  %v754_v11 = vadd.f32 %v1161_v20, %v753_v4 }
  0xb9   : > { %v808_v3 = vmul.f32 %v733_v48, %v2078_v37  ;;  %v743_v10 = vsel %vm2179_vm9, %v1159_v22, %v739_v54  ;;  %v777_v37 = vor.u32 1.1754944e-38, %v776_v36  ;;  %v769_v13 = vadd.f32 %v1163_v21, %v768_v23 }
  0xba   : > { %v748_v26 = vsel %vm2156_vm3, %v747_v43, %v743_v10  ;;  %v758_v6 = vsel %vm2197_vm11, %v1161_v20, %v754_v11 }
  0xbb   : > { %840 = vst [vmem:[%s1529_s17 + $0xe0] sm:$0xff] %v808_v3  ;;  %v809_v5 = vmul.f32 %v748_v26, %v2081_v19  ;;  %v763_v27 = vsel %vm760_vm12, %v762_v41, %v758_v6  ;;  %v773_v61 = vsel %vm772_vm13, %v1163_v21, %v769_v13 }
  0xbc   : > { %v810_v30 = vmul.f32 %v763_v27, %v2086_v0  ;;  %v778_v49 = vsel %vm775_vm15, %v777_v37, %v773_v61 }
  0xbd   : > { %841 = vst [vmem:[%s1529_s17 + $0xe8] sm:$0xff] %v809_v5  ;;  %v811_v39 = vmul.f32 %v778_v49, %v2092_v1 }
  0xbe   : > { %842 = vst [vmem:[%s1529_s17 + $0xf0] sm:$0xff] %v810_v30 }
  0xbf   : > { %843 = vst [vmem:[%s1529_s17 + $0xf8] sm:$0xff] %v811_v39 }
  0xc0   : > { %1221 = shalt.err (!%p1218_p4)
}
  0xc1   : > { %s1264_s16 = smov 512   ;;  %s1265_s20 = smov 32  }
  0xc2   : > { %988 = dma.vmem_to_hbm [thread:$0]  (%p1325_p10), %s859_s28, 4096, %s861_s29, %s845_s30, %s1264_s16, %s1264_s16, %s1265_s20  }
  0xc3 PF: > { %p999_p5 = scmp.ge.s32.totalorder %s1260_s9, 2  ;;  %s875_s21 = sand.u32 1, %s1248_s6  }
  0xc4   : > { %s876_s22 = scalar_lea.sflag [#allocation4], %s875_s21 }
  0xc5   : > { %p995_p7 = pnand %p999_p5, %p1329_p11 }
  0xc7   : > { %p996_p8 = pneg %p995_p7 }
  0xc9   : > { %1243 = dma.done.wait (%p996_p8), %s876_s22, 4096  }
  0xca   : > { %1245 = vsyncadd (%p996_p8), %s876_s22, 4294963200  ;;  %p14_p9 = scmp.ge.s32.totalorder %s1301_s12, 6   ;;  %s2363_s6 = smov %s1252_s7 }
  0xcb   : > { %s2364_s7 = smov %s1256_s8  ;;  %s2365_s8 = smov %s1313_s15 }
  0xcc   : > { %s2366_s9 = smov %s1301_s12  ;;  %16 = sbr.rel (!%p14_p9) target bundleno = 5 (0x5), region = 69 }
  0xd1   :  { %882 = vsyncpa [#allocation3], 1 }
  0xd2   :  { %884 = vsyncpa [#allocation3 + $0x1], 1 }
  0xd3   :  { %885 = vsyncpa [#allocation4], 1 }
  0xd4   :  { %887 = vsyncpa [#allocation4 + $0x1], 1 }

</bundles_post_ra>
